<compile_context>
chip_gen: v6e
topology: v6e:2x2x1
jax: 0.10.0
libtpu: 0.0.40
codegen_flags: <defaults>
</compile_context>

<pallas_src>
import functools

import jax
import jax.numpy as jnp
from jax.experimental import pallas as pl
from jax.experimental.pallas import tpu as pltpu


def _msblock_kernel(x_ref, w_ref, b_ref, o_ref, xcol_ref, *,
                    hidden, k_max, C, W, HW):
    """One grid step == one batch element.

    x_ref:    (C, H_pad*W) f32     H-padded input slab for this batch.
    w_ref:    (3*hidden, k_max*C)  fused per-branch weights (resident).
    b_ref:    (3*hidden, 1)        fused biases.
    o_ref:    (hidden, H*W)        output tile, lane-dense, final layout.
    xcol_ref: (k_max*C, H*W) f32   VMEM scratch: tap-stacked MXU operand.
    """
    # Assemble the tap-stacked operand in VMEM with static, unrolled copies so a
    # SINGLE K = k_max*C matmul feeds the MXU (instead of k_max tiny K=C ones).
    # Tap dk == shift by dk*W lanes of the flattened padded axis.
    for dk in range(k_max):
        xcol_ref[dk * C:(dk + 1) * C, :] = x_ref[:, dk * W:dk * W + HW]

    acc = jnp.dot(w_ref[...], xcol_ref[...],
                  preferred_element_type=jnp.float32)        # (3*hidden, HW) f32
    acc = acc + b_ref[...]                                    # bias over lanes

    # Per-branch tanh (EUP slot), accumulated sequentially into one live value.
    # NOTE: hidden should be a multiple of 8 so these sublane slices stay
    # aligned (perf only, not correctness).
    out = jnp.tanh(acc[0:hidden])
    out = out + jnp.tanh(acc[hidden:2 * hidden])
    out = out + jnp.tanh(acc[2 * hidden:3 * hidden])
    o_ref[...] = out.astype(o_ref.dtype)


def _build_fused_weight(params, kernel_lengths, hidden, C):
    """(3*hidden, k_max*C) f32; shorter kernels zero-padded to k_max taps."""
    k_max = max(kernel_lengths)
    max_left = (k_max - 1) // 2
    blocks = []
    for i, k in enumerate(kernel_lengths, start=1):
        w = params[f"w{i}"]                                   # (k, hidden, C)
        left = (k - 1) // 2
        off = max_left - left                                 # tap offset in k_max
        wk = jnp.zeros((k_max, hidden, C), w.dtype).at[off:off + k].set(w)
        blocks.append(jnp.transpose(wk, (1, 0, 2)).reshape(hidden, k_max * C))
    return jnp.concatenate(blocks, axis=0).astype(jnp.float32)


def prepare_msblock_weights(params, kernel_lengths):
    """Build the fused weight/bias ONCE; reuse across forward calls (review #3)."""
    hidden = params["w1"].shape[1]
    C = params["w1"].shape[2]
    w_fused = _build_fused_weight(params, kernel_lengths, hidden, C)   # (3h, Kc)
    b_fused = jnp.concatenate(
        [params["b1"], params["b2"], params["b3"]], axis=0).astype(jnp.float32)
    return w_fused, b_fused


@functools.partial(jax.jit, static_argnames=("kernel_lengths", "out_dtype"))
def msblock_forward(x, w_fused, b_fused, kernel_lengths, out_dtype=jnp.float32):
    """x: (B, C, H, W) float32.  Returns (B, hidden, H, W) in out_dtype."""
    B, C, H, W = x.shape
    k_max = max(kernel_lengths)
    max_left = (k_max - 1) // 2
    max_right = (k_max - 1) - max_left
    three_h, Kc = w_fused.shape
    hidden = three_h // 3
    assert Kc == k_max * C
    HW = H * W
    H_pad = H + k_max - 1
    HPW = H_pad * W

    # Only pre-kernel op on x: halo pad along H (minor traffic, ~input bytes),
    # then a FREE row-major reshape that folds (H_pad, W) into one lane axis.
    x_flat = jnp.pad(
        x, ((0, 0), (0, 0), (max_left, max_right), (0, 0))).reshape(B, C, HPW)

    kernel = functools.partial(
        _msblock_kernel, hidden=hidden, k_max=k_max, C=C, W=W, HW=HW)

    # Per-step VMEM working set (double-buffered in/out blocks + scratch +
    # resident weights) is ~125 KiB at the demo shape - far under every
    # generation's scoped limit.
    # TODO(synk): for very large H*W, halo-tile the flattened H*W axis (tile
    # size derived from the VMEM budget) instead of one full slab per batch.
    out = pl.pallas_call(
        kernel,
        out_shape=jax.ShapeDtypeStruct((B, hidden, HW), out_dtype),
        grid=(B,),
        in_specs=[
            pl.BlockSpec((None, C, HPW), lambda b: (b, 0, 0)),      # per-batch slab
            pl.BlockSpec((three_h, Kc), lambda b: (0, 0)),          # resident weights
            pl.BlockSpec((three_h, 1), lambda b: (0, 0)),           # resident bias
        ],
        out_specs=pl.BlockSpec((None, hidden, HW), lambda b: (b, 0, 0)),
        scratch_shapes=[pltpu.VMEM((Kc, HW), jnp.float32)],
        compiler_params=pltpu.CompilerParams(
            dimension_semantics=("parallel",),
            vmem_limit_bytes=32 * 1024 * 1024),
    )(x_flat, w_fused, b_fused)

    # (B, hidden, H*W) -> (B, hidden, H, W): row-major, metadata-only reshape
    # (no HBM transpose).
    return out.reshape(B, hidden, H, W)


def _ref_msblock(x, params, kernel_lengths):
    """Pure-JAX f32 reference replicating the PyTorch module semantics."""
    def conv_same_h(x, w, b, k):
        left = (k - 1) // 2
        right = (k - 1) - left
        xp = jnp.pad(x, ((0, 0), (0, 0), (left, right), (0, 0)))
        H = x.shape[2]
        out = jnp.zeros((x.shape[0], w.shape[1], H, x.shape[3]), jnp.float32)
        for dk in range(k):
            out = out + jnp.einsum("oc,bchw->bohw", w[dk], xp[:, :, dk:dk + H, :])
        return out + b.reshape(1, -1, 1, 1)

    k1, k2, k3 = kernel_lengths
    y1 = jnp.tanh(conv_same_h(x, params["w1"], params["b1"], k1))
    y2 = jnp.tanh(conv_same_h(x, params["w2"], params["b2"], k2))
    y3 = jnp.tanh(conv_same_h(x, params["w3"], params["b3"], k3))
    return y1 + y2 + y3


def init_params(key, input_channels, kernel_lengths, hidden_size):
    """Deterministic parameter init. Weights stored as (k, hidden, C_in);
    corresponds to PyTorch Conv2d weight (hidden, C_in, k, 1) transposed."""
    keys = jax.random.split(key, 6)
    params = {}
    for i, k in enumerate(kernel_lengths, start=1):
        fan_in = input_channels * k
        scale = 1.0 / jnp.sqrt(fan_in)
        params[f"w{i}"] = scale * jax.random.normal(
            keys[2 * (i - 1)], (k, hidden_size, input_channels), jnp.float32)
        params[f"b{i}"] = scale * jax.random.normal(
            keys[2 * (i - 1) + 1], (hidden_size, 1), jnp.float32)
    return params


if __name__ == "__main__":
    B, C, H, W = 2, 4, 16, 16
    hidden = 32
    kernel_lengths = (3, 5, 7)

    key = jax.random.PRNGKey(0)
    kx, kp = jax.random.split(key)
    x = jax.random.normal(kx, (B, C, H, W), jnp.float32)
    params = init_params(kp, C, kernel_lengths, hidden)

    # Fused weights built once, reused for every forward call.
    w_fused, b_fused = prepare_msblock_weights(params, kernel_lengths)

    out = jax.block_until_ready(
        msblock_forward(x, w_fused, b_fused, kernel_lengths=kernel_lengths))

    ref = _ref_msblock(x, params, kernel_lengths)
    assert out.shape == (B, hidden, H, W)
    # Tolerance covers MXU matmul precision (worst case single bf16 pass on the
    # K=28 contraction); values are stored/accumulated in f32 throughout.
    max_err = float(jnp.max(jnp.abs(out - ref)))
    assert jnp.allclose(out, ref, atol=5e-2, rtol=5e-2), f"max abs err {max_err}"

    print("KERNEL_OK")
</pallas_src>

<mosaic_0001>
module attributes {stable_mosaic.version = 11 : i64} {
  func.func @_msblock_kernel(%arg0: i32, %arg1: memref<1x4x352xf32, #tpu.memory_space<vmem>>, %arg2: memref<96x28xf32, #tpu.memory_space<vmem>>, %arg3: memref<96x1xf32, #tpu.memory_space<vmem>>, %arg4: memref<1x32x256xf32, #tpu.memory_space<vmem>>, %arg5: memref<28x256xf32, #tpu.memory_space<vmem>>) attributes {dimension_semantics = [#tpu.dimension_semantics<parallel>], iteration_bounds = array<i64: 2>, scalar_prefetch = 0 : i64, scratch_operands = 1 : i64, tpu.core_type = #tpu.core_type<tc>, window_params = [{transform_indices = @transform_0, window_bounds = array<i64: 1, 4, 352>}, {pipeline_mode = #tpu.pipeline_mode<synchronous>, transform_indices = @transform_1, window_bounds = array<i64: 96, 28>}, {pipeline_mode = #tpu.pipeline_mode<synchronous>, transform_indices = @transform_2, window_bounds = array<i64: 96, 1>}, {transform_indices = @transform_3, window_bounds = array<i64: 1, 32, 256>}]} {
    %c0 = arith.constant 0 : index
    %c0_0 = arith.constant 0 : index
    %c0_1 = arith.constant 0 : index
    %0 = vector.load %arg1[%c0, %c0_0, %c0_1] : memref<1x4x352xf32, #tpu.memory_space<vmem>>, vector<1x4x256xf32>
    %1 = vector.shape_cast %0 : vector<1x4x256xf32> to vector<4x256xf32>
    %c0_2 = arith.constant 0 : index
    %c0_3 = arith.constant 0 : index
    %2 = vector.load %arg5[%c0_2, %c0_3] : memref<28x256xf32, #tpu.memory_space<vmem>>, vector<4x256xf32>
    tpu.vector_store %arg5[%c0_2, %c0_3], %1 {strides = array<i32>} : memref<28x256xf32, #tpu.memory_space<vmem>>, vector<4x256xf32>,
    %c0_4 = arith.constant 0 : index
    %c0_5 = arith.constant 0 : index
    %c16 = arith.constant 16 : index
    %3 = vector.load %arg1[%c0_4, %c0_5, %c16] : memref<1x4x352xf32, #tpu.memory_space<vmem>>, vector<1x4x256xf32>
    %4 = vector.shape_cast %3 : vector<1x4x256xf32> to vector<4x256xf32>
    %c4 = arith.constant 4 : index
    %c0_6 = arith.constant 0 : index
    %5 = vector.load %arg5[%c4, %c0_6] : memref<28x256xf32, #tpu.memory_space<vmem>>, vector<4x256xf32>
    tpu.vector_store %arg5[%c4, %c0_6], %4 {strides = array<i32>} : memref<28x256xf32, #tpu.memory_space<vmem>>, vector<4x256xf32>,
    %c0_7 = arith.constant 0 : index
    %c0_8 = arith.constant 0 : index
    %c32 = arith.constant 32 : index
    %6 = vector.load %arg1[%c0_7, %c0_8, %c32] : memref<1x4x352xf32, #tpu.memory_space<vmem>>, vector<1x4x256xf32>
    %7 = vector.shape_cast %6 : vector<1x4x256xf32> to vector<4x256xf32>
    %c8 = arith.constant 8 : index
    %c0_9 = arith.constant 0 : index
    %8 = vector.load %arg5[%c8, %c0_9] : memref<28x256xf32, #tpu.memory_space<vmem>>, vector<4x256xf32>
    tpu.vector_store %arg5[%c8, %c0_9], %7 {strides = array<i32>} : memref<28x256xf32, #tpu.memory_space<vmem>>, vector<4x256xf32>,
    %c0_10 = arith.constant 0 : index
    %c0_11 = arith.constant 0 : index
    %c48 = arith.constant 48 : index
    %9 = vector.load %arg1[%c0_10, %c0_11, %c48] : memref<1x4x352xf32, #tpu.memory_space<vmem>>, vector<1x4x256xf32>
    %10 = vector.shape_cast %9 : vector<1x4x256xf32> to vector<4x256xf32>
    %c12 = arith.constant 12 : index
    %c0_12 = arith.constant 0 : index
    %11 = vector.load %arg5[%c12, %c0_12] : memref<28x256xf32, #tpu.memory_space<vmem>>, vector<4x256xf32>
    tpu.vector_store %arg5[%c12, %c0_12], %10 {strides = array<i32>} : memref<28x256xf32, #tpu.memory_space<vmem>>, vector<4x256xf32>,
    %c0_13 = arith.constant 0 : index
    %c0_14 = arith.constant 0 : index
    %c64 = arith.constant 64 : index
    %12 = vector.load %arg1[%c0_13, %c0_14, %c64] : memref<1x4x352xf32, #tpu.memory_space<vmem>>, vector<1x4x256xf32>
    %13 = vector.shape_cast %12 : vector<1x4x256xf32> to vector<4x256xf32>
    %c16_15 = arith.constant 16 : index
    %c0_16 = arith.constant 0 : index
    %14 = vector.load %arg5[%c16_15, %c0_16] : memref<28x256xf32, #tpu.memory_space<vmem>>, vector<4x256xf32>
    tpu.vector_store %arg5[%c16_15, %c0_16], %13 {strides = array<i32>} : memref<28x256xf32, #tpu.memory_space<vmem>>, vector<4x256xf32>,
    %c0_17 = arith.constant 0 : index
    %c0_18 = arith.constant 0 : index
    %c80 = arith.constant 80 : index
    %15 = vector.load %arg1[%c0_17, %c0_18, %c80] : memref<1x4x352xf32, #tpu.memory_space<vmem>>, vector<1x4x256xf32>
    %16 = vector.shape_cast %15 : vector<1x4x256xf32> to vector<4x256xf32>
    %c20 = arith.constant 20 : index
    %c0_19 = arith.constant 0 : index
    %17 = vector.load %arg5[%c20, %c0_19] : memref<28x256xf32, #tpu.memory_space<vmem>>, vector<4x256xf32>
    tpu.vector_store %arg5[%c20, %c0_19], %16 {strides = array<i32>} : memref<28x256xf32, #tpu.memory_space<vmem>>, vector<4x256xf32>,
    %c0_20 = arith.constant 0 : index
    %c0_21 = arith.constant 0 : index
    %c96 = arith.constant 96 : index
    %18 = vector.load %arg1[%c0_20, %c0_21, %c96] : memref<1x4x352xf32, #tpu.memory_space<vmem>>, vector<1x4x256xf32>
    %19 = vector.shape_cast %18 : vector<1x4x256xf32> to vector<4x256xf32>
    %c24 = arith.constant 24 : index
    %c0_22 = arith.constant 0 : index
    %20 = vector.load %arg5[%c24, %c0_22] : memref<28x256xf32, #tpu.memory_space<vmem>>, vector<4x256xf32>
    tpu.vector_store %arg5[%c24, %c0_22], %19 {strides = array<i32>} : memref<28x256xf32, #tpu.memory_space<vmem>>, vector<4x256xf32>,
    %c0_23 = arith.constant 0 : index
    %c0_24 = arith.constant 0 : index
    %21 = vector.load %arg2[%c0_23, %c0_24] : memref<96x28xf32, #tpu.memory_space<vmem>>, vector<96x28xf32>
    %c0_25 = arith.constant 0 : index
    %c0_26 = arith.constant 0 : index
    %22 = vector.load %arg5[%c0_25, %c0_26] : memref<28x256xf32, #tpu.memory_space<vmem>>, vector<28x256xf32>
    %cst = arith.constant dense<0.000000e+00> : vector<96x256xf32>
    %23 = tpu.matmul %21, %22, %cst {dimension_numbers = #tpu.dot_dimension_numbers<[1], [0], [0], [1], [0, 0, 1, 1], [], []>} : vector<96x28xf32>, vector<28x256xf32>, vector<96x256xf32> -> vector<96x256xf32>
    %c0_27 = arith.constant 0 : index
    %c0_28 = arith.constant 0 : index
    %24 = vector.load %arg3[%c0_27, %c0_28] : memref<96x1xf32, #tpu.memory_space<vmem>>, vector<96x1xf32>
    %25 = vector.broadcast %24 : vector<96x1xf32> to vector<96x256xf32>
    %26 = arith.addf %23, %25 : vector<96x256xf32>
    %27 = vector.extract_strided_slice %26 {offsets = [0, 0], sizes = [32, 256], strides = [1, 1]} : vector<96x256xf32> to vector<32x256xf32>
    %28 = math.tanh %27 : vector<32x256xf32>
    %29 = vector.extract_strided_slice %26 {offsets = [32, 0], sizes = [32, 256], strides = [1, 1]} : vector<96x256xf32> to vector<32x256xf32>
    %30 = math.tanh %29 : vector<32x256xf32>
    %31 = arith.addf %28, %30 : vector<32x256xf32>
    %32 = vector.extract_strided_slice %26 {offsets = [64, 0], sizes = [32, 256], strides = [1, 1]} : vector<96x256xf32> to vector<32x256xf32>
    %33 = math.tanh %32 : vector<32x256xf32>
    %34 = arith.addf %31, %33 : vector<32x256xf32>
    %c0_29 = arith.constant 0 : index
    %c0_30 = arith.constant 0 : index
    %c0_31 = arith.constant 0 : index
    %35 = vector.load %arg4[%c0_29, %c0_30, %c0_31] : memref<1x32x256xf32, #tpu.memory_space<vmem>>, vector<1x32x256xf32>
    %36 = vector.shape_cast %35 : vector<1x32x256xf32> to vector<32x256xf32>
    %37 = vector.shape_cast %34 : vector<32x256xf32> to vector<1x32x256xf32>
    tpu.vector_store %arg4[%c0_29, %c0_30, %c0_31], %37 {strides = array<i32>} : memref<1x32x256xf32, #tpu.memory_space<vmem>>, vector<1x32x256xf32>,
    return
  }
  func.func @transform_0(%arg0: i32) -> (i32, i32, i32) {
    %c0_i32 = arith.constant 0 : i32
    %c0_i32_0 = arith.constant 0 : i32
    %c0_i32_1 = arith.constant 0 : i32
    return %arg0, %c0_i32, %c0_i32_0 : i32, i32, i32
  }
  func.func @transform_1(%arg0: i32) -> (i32, i32) {
    %c0_i32 = arith.constant 0 : i32
    %c0_i32_0 = arith.constant 0 : i32
    %c0_i32_1 = arith.constant 0 : i32
    return %c0_i32, %c0_i32_0 : i32, i32
  }
  func.func @transform_2(%arg0: i32) -> (i32, i32) {
    %c0_i32 = arith.constant 0 : i32
    %c0_i32_0 = arith.constant 0 : i32
    %c0_i32_1 = arith.constant 0 : i32
    return %c0_i32, %c0_i32_0 : i32, i32
  }
  func.func @transform_3(%arg0: i32) -> (i32, i32, i32) {
    %c0_i32 = arith.constant 0 : i32
    %c0_i32_0 = arith.constant 0 : i32
    %c0_i32_1 = arith.constant 0 : i32
    return %arg0, %c0_i32, %c0_i32_0 : i32, i32, i32
  }
}

</mosaic_0001>

<bundles_post_ra>
// kernel: msblock_forward.1
= control target key start
LH: loop header
LB: loop body
LE: loop exit
PB: predicated region body
PF: predicated region fallthrough
CT: control target
= control target key end

     0   :  { %s805_s12 = smov 0   ;;  %s939_s0 = inlined_call_operand.vmem [shape: f32[2,4,352], index: 0, kind: input, shape index: {}]   ;;  %s940_s1 = inlined_call_operand.vmem [shape: f32[96,28], index: 1, kind: input, shape index: {}]   ;;  %s941_s2 = inlined_call_operand.vmem [shape: f32[96,1], index: 2, kind: input, shape index: {}]   ;;  %s942_s3 = inlined_call_operand.vmem [shape: f32[2,32,256], index: 3, kind: output, shape index: {}]  }
   0x1 LB: > { %s664_s13 = sadd.s32 4294967295, %s775_s12   ;;  %p668_p0 = scmp.ge.s32.totalorder %s775_s12, 1  ;;  %s775_s12 = sphi %s805_s12, %s13_s12  }
   0x2   : > { %p137_p1 = scmp.lt.s32.totalorder %s775_s12, 3 }
   0x4   : > { %p138_p2 = pnand %p668_p0, %p137_p1 }
   0x5   : > { %p161_p3 = scmp.lt.s32.totalorder (!%p138_p2), %s664_s13, 1  ;;  %s777_s18 = smov (!%p138_p2), 32  }
   0x6   : > { %141 = sbr.rel (%p138_p2) target bundleno = 410 (0x19a), region = 32  ;;  %s778_s19 = smov (!%p138_p2), 48  }
   0x7   : > { %s779_s20 = smov (!%p138_p2), 64   ;;  %s780_s21 = smov (!%p138_p2), 96  }
   0x8   : > { %s781_s22 = smov (!%p138_p2), 80   ;;  %s782_s23 = smov (!%p138_p2), 112  }
   0xb   : > { %s944_s13 = smov (!%p161_p3, %s664_s13), 1  ;;  %v783_v9 = vmov 0.0   ;;  %v308_v10 = vld [vmem:[%s941_s2] sm:$0xff]  ;;  %v309_v11 = vld [vmem:[%s941_s2 + $0x8] sm:$0xff]  ;;  %v784_v12 = vmov 0   ;;  %v311_v13 = vld [vmem:[%s941_s2 + $0x18] sm:$0xff] }
   0xc   : > { %s697_s14 = smul.u32 12, %s944_s13  ;;  %488 = vmatprep.mubr.f32.mxu0 %v783_v9  ;;  %524 = vmatprep.mubr.f32.mxu1 %v783_v9  ;;  %v310_v14 = vld [vmem:[%s941_s2 + $0x10] sm:$0xff]  ;;  %v313_v15 = vld [vmem:[%s941_s2 + $0x28] sm:$0xff]  ;;  %v312_v16 = vld [vmem:[%s941_s2 + $0x20] sm:$0xff]  ;;  %vm281_vm0 = vcmask 261120   ;;  %vm244_vm1 = vcmask 523264  }
   0xd   : > { %715 = vset.pattern.permute.xlu1 %v784_v12  ;;  %714 = vset.pattern.permute.xlu0 %v784_v12  ;;  %v315_v17 = vld [vmem:[%s941_s2 + $0x38] sm:$0xff]  ;;  %v314_v18 = vld [vmem:[%s941_s2 + $0x30] sm:$0xff]  ;;  %v317_v19 = vld [vmem:[%s941_s2 + $0x48] sm:$0xff]  ;;  %vm263_vm2 = vcmask 392192   ;;  %vm417_vm3 = vcmask 1043456   ;;  %vm207_vm4 = vcmask 785408  }
   0xe   : > { %s819_s17 = scalar_lea.vmem %s939_s0, %s697_s14  ;;  %v316_v20 = vld [vmem:[%s941_s2 + $0x40] sm:$0xff]  ;;  %v319_v21 = vld [vmem:[%s941_s2 + $0x58] sm:$0xff]  ;;  %v318_v22 = vld [vmem:[%s941_s2 + $0x50] sm:$0xff]  ;;  %vm226_vm5 = vcmask 654336   ;;  %vm189_vm6 = vcmask 916480   ;;  %vm380_vm7 = vcmask 228352  }
   0xf   : > { %v271_v0 = vld [vmem:[%s819_s17 + $0x8] sm:$0xf]  ;;  %v270_v1 = vld [vmem:[%s819_s17] sm:$0xff]  ;;  %v294_v62 = vld [vmem:[%s940_s1 + $0x30] sm:$0xff] }
  0x10   : > { %279 = vrot.lane.b32.xlu0 %v271_v0, %s777_s18  ;;  %275 = vrot.lane.b32.xlu1 %v270_v1, %s777_s18  ;;  %v274_v2 = vcombine.high %v270_v1, %v270_v1  ;;  %175 = vst [vmem:[#allocation2 + $0x30] sm:$0xf] %v270_v1  ;;  %v234_v3 = vld [vmem:[%s819_s17 + $0x8] sm:$0xf]  ;;  %v255_v5 = vcombine.low %v270_v1, %v270_v1  ;;  %v288_v59 = vld [vmem:[%s940_s1] sm:$0xff] }
  0x11   : > { %v718_v4 = vld [vmem:[%s819_s17 + $0x8] ss:$0 sps:$4 sm:$0xff]   ;;  %v295_v0 = vld [vmem:[%s940_s1 + $0x38] sm:$0xff] }
  0x12   : > { %176 = vst [vmem:[#allocation2] sm:$0xf] %v274_v2  ;;  %v197_v6 = vld [vmem:[%s819_s17 + $0x8] sm:$0xf] }
  0x13   : > { %v719_v7 = vld [vmem:[%s819_s17 + $0x8] ss:$0 sps:$4 sm:$0xff]  }
  0x14   : > { %259 = vrot.lane.b32.xlu1 %v270_v1, %s778_s19  ;;  %242 = vrot.lane.b32.xlu0 %v234_v3, %s779_s20  ;;  %v720_v8 = vld [vmem:[%s819_s17 + $0x8] ss:$0 sps:$4 sm:$0xff]   ;;  %v291_v3 = vld [vmem:[%s940_s1 + $0x18] sm:$0xff] }
  0x15   : > { %v289_v63 = vld [vmem:[%s940_s1 + $0x8] sm:$0xff] }
  0x18   : > { %277 = vrot.lane.b32.xlu0 %v274_v2, %s777_s18  ;;  %240 = vrot.lane.b32.xlu1 %v274_v2, %s779_s20 }
  0x1c   : > { %261 = vrot.lane.b32.xlu0 %v718_v4, %s778_s19  ;;  %238 = vrot.lane.b32.xlu1 %v270_v1, %s779_s20  ;;  %v297_v4 = vld [vmem:[%s940_s1 + $0x48] sm:$0xff] }
  0x20   : > { %257 = vrot.lane.b32.xlu0 %v255_v5, %s778_s19  ;;  %203 = vrot.lane.b32.xlu1 %v274_v2, %s780_s21  ;;  %v296_v2 = vld [vmem:[%s940_s1 + $0x40] sm:$0xff] }
  0x24   : > { %205 = vrot.lane.b32.xlu0 %v197_v6, %s780_s21  ;;  %222 = vrot.lane.b32.xlu1 %v270_v1, %s781_s22  ;;  %v298_v6 = vld [vmem:[%s940_s1 + $0x50] sm:$0xff] }
  0x28   : > { %224 = vrot.lane.b32.xlu0 %v719_v7, %s781_s22  ;;  %201 = vrot.lane.b32.xlu1 %v270_v1, %s780_s21  ;;  %v293_v7 = vld [vmem:[%s940_s1 + $0x28] sm:$0xff] }
  0x2c   : > { %220 = vrot.lane.b32.xlu0 %v255_v5, %s781_s22  ;;  %185 = vrot.lane.b32.xlu1 %v270_v1, %s782_s23  ;;  %v290_v1 = vld [vmem:[%s940_s1 + $0x10] sm:$0xff]  ;;  %s688_s22 = sshll.u32 %s944_s13, 6 }
  0x2d   : > { %s170_s25 = scalar_lea.vmem %s942_s3, %s688_s22 }
  0x30   : > { %187 = vrot.lane.b32.xlu0 %v720_v8, %s782_s23  ;;  %183 = vrot.lane.b32.xlu1 %v255_v5, %s782_s23  ;;  %v292_v5 = vld [vmem:[%s940_s1 + $0x20] sm:$0xff]  ;;  %v299_v8 = vld [vmem:[%s940_s1 + $0x58] sm:$0xff] }
  0x34   : > { %322 = vperm.xlu0 %714, %v308_v10   ;;  %327 = vperm.xlu1 %715, %v309_v11  }
  0x38   : > { %337 = vperm.xlu0 %714, %v311_v13   ;;  %332 = vperm.xlu1 %715, %v310_v14  }
  0x3c   : > { %347 = vperm.xlu0 %714, %v313_v15   ;;  %342 = vperm.xlu1 %715, %v312_v16  }
  0x40   : > { %357 = vperm.xlu0 %714, %v315_v17   ;;  %352 = vperm.xlu1 %715, %v314_v18  }
  0x44   : > { %367 = vperm.xlu0 %714, %v317_v19   ;;  %362 = vperm.xlu1 %715, %v316_v20  }
  0x48   : > { %377 = vperm.xlu0 %714, %v319_v21   ;;  %372 = vperm.xlu1 %715, %v318_v22  }
  0x82   : > { %v280_v23 = vpop.permute.xlu0 %279  ;;  %v276_v24 = vpop.permute.xlu1 %275 }
  0x86   : > { %v260_v25 = vpop.permute.xlu1 %259  ;;  %v243_v26 = vpop.permute.xlu0 %242 }
  0x8a   : > { %v278_v27 = vpop.permute.xlu0 %277  ;;  %v241_v28 = vpop.permute.xlu1 %240 }
  0x8b   : > { %v282_v29 = vsel %vm281_vm0, %v276_v24, %v278_v27  ;;  %v283_v30 = vsel %vm281_vm0, %v278_v27, %v280_v23  ;;  %v246_v31 = vsel %vm244_vm1, %v241_v28, %v243_v26 }
  0x8c   : > { %286 = vst [vmem:[#allocation2 + $0x28] sm:$0xf] %v282_v29  ;;  %287 = vst [vmem:[#allocation2 + $0x38] sm:$0xf] %v283_v30 }
  0x8d   : > { %250 = vst [vmem:[#allocation2 + $0x20] sm:$0xf] %v246_v31 }
  0x8e   : > { %v262_v32 = vpop.permute.xlu0 %261  ;;  %v239_v33 = vpop.permute.xlu1 %238 }
  0x8f   : > { %v265_v34 = vsel %vm263_vm2, %v260_v25, %v262_v32  ;;  %v245_v35 = vsel %vm244_vm1, %v239_v33, %v241_v28 }
  0x90   : > { %269 = vst [vmem:[#allocation2 + $0x20] sm:$0xf0] %v265_v34  ;;  %249 = vst [vmem:[#allocation2 + $0x8] sm:$0xf] %v245_v35 }
  0x92   : > { %v258_v36 = vpop.permute.xlu0 %257  ;;  %v204_v37 = vpop.permute.xlu1 %203 }
  0x93   : > { %v264_v38 = vsel %vm263_vm2, %v258_v36, %v260_v25  ;;  %v307_v39 = vld [vmem:[#allocation2 + $0x38] sm:$0xf]  ;;  %v306_v40 = vld [vmem:[#allocation2 + $0x28] sm:$0xf] }
  0x94   : > { %268 = vst [vmem:[#allocation2 + $0x8] sm:$0xf0] %v264_v38  ;;  %672 = vmatprep.subr.msk.mxu0 %vm417_vm3, %v307_v39  ;;  %689 = vmatprep.subr.msk.mxu1 %vm417_vm3, %v307_v39 }
  0x95   : > { %673 = vmatpush1.msk.msra.mxu0 %vm417_vm3, %v306_v40  ;;  %693 = vmatpush1.msk.msra.mxu1 %vm417_vm3, %v306_v40 }
  0x96   : > { %v206_v41 = vpop.permute.xlu0 %205  ;;  %v223_v42 = vpop.permute.xlu1 %222 }
  0x97   : > { %v209_v43 = vsel %vm207_vm4, %v204_v37, %v206_v41  ;;  %v305_v44 = vld [vmem:[#allocation2 + $0x20] sm:$0xff] }
  0x98   : > { %213 = vst [vmem:[#allocation2 + $0x10] sm:$0xf] %v209_v43  ;;  %450 = vmatprep.subr.mxu0 %v305_v44  ;;  %690 = vmatprep.subr.mxu1 %v305_v44 }
  0x9a   : > { %v225_v45 = vpop.permute.xlu0 %224  ;;  %v202_v46 = vpop.permute.xlu1 %201 }
  0x9b   : > { %v228_v47 = vsel %vm226_vm5, %v223_v42, %v225_v45  ;;  %v208_v48 = vsel %vm207_vm4, %v202_v46, %v204_v37  ;;  %v304_v49 = vld [vmem:[#allocation2 + $0x8] sm:$0xff] }
  0x9c   : > { %232 = vst [vmem:[#allocation2 + $0x10] sm:$0xf0] %v228_v47  ;;  %212 = vst [vmem:[#allocation2 + $0x18] sm:$0xf] %v208_v48  ;;  %451 = vmatpush1.msra.mxu0 %v304_v49  ;;  %694 = vmatpush1.msra.mxu1 %v304_v49 }
  0x9e   : > { %v221_v50 = vpop.permute.xlu0 %220  ;;  %v186_v51 = vpop.permute.xlu1 %185 }
  0x9f   : > { %v227_v52 = vsel %vm226_vm5, %v221_v50, %v223_v42 }
  0xa0   : > { %231 = vst [vmem:[#allocation2 + $0x18] sm:$0xf0] %v227_v52 }
  0xa2   : > { %v188_v53 = vpop.permute.xlu0 %187  ;;  %v184_v54 = vpop.permute.xlu1 %183 }
  0xa3   : > { %v191_v55 = vsel %vm189_vm6, %v186_v51, %v188_v53  ;;  %v190_v56 = vsel %vm189_vm6, %v184_v54, %v186_v51  ;;  %v303_v57 = vld [vmem:[#allocation2 + $0x10] sm:$0xff] }
  0xa4   : > { %195 = vst [vmem:[#allocation2] sm:$0xf0] %v191_v55  ;;  %194 = vst [vmem:[#allocation2 + $0x30] sm:$0xf0] %v190_v56  ;;  %452 = vmatprep.subr.mxu0 %v303_v57  ;;  %691 = vmatprep.subr.mxu1 %v303_v57 }
  0xa7   : > { %v302_v58 = vld [vmem:[#allocation2 + $0x18] sm:$0xff] }
  0xa8   : > { %453 = vmatpush1.msra.mxu0 %v302_v58  ;;  %695 = vmatpush1.msra.mxu1 %v302_v58 }
  0xab   : > { %v301_v60 = vld [vmem:[#allocation2] sm:$0xff]  ;;  %v300_v61 = vld [vmem:[#allocation2 + $0x30] sm:$0xff] }
  0xac   : > { %454 = vmatprep.subr.mxu0 %v301_v60  ;;  %692 = vmatprep.subr.mxu1 %v301_v60 }
  0xad   : > { %455 = vmatpush1.msra.mxu0 %v300_v61  ;;  %696 = vmatpush1.msra.mxu1 %v300_v61 }
  0xae   : > { %674 = vmatmul.mubr.msk.f32.vlgmr.msra.gmra.mxu0 %vm380_vm7, %v288_v59  ;;  %680 = vmatmul.mubr.msk.f32.vlgmr.msra.gmra.mxu1 %vm380_vm7, %v294_v62 }
  0xaf   : > { %494 = vmatprep.mubr.f32.mxu0 %v783_v9  ;;  %530 = vmatprep.mubr.f32.mxu1 %v783_v9  ;;  %v328_v10 = vpop.permute.xlu1 %327  ;;  %v323_v11 = vpop.permute.xlu0 %322 }
  0xb2   : > { %675 = vmatmul.mubr.msk.f32.gmra.mxu0 %vm380_vm7, %v289_v63  ;;  %681 = vmatmul.mubr.msk.f32.gmra.mxu1 %vm380_vm7, %v295_v0 }
  0xb3   : > { %500 = vmatprep.mubr.f32.mxu0 %v783_v9  ;;  %536 = vmatprep.mubr.f32.mxu1 %v783_v9  ;;  %v333_v12 = vpop.permute.xlu1 %332  ;;  %v338_v13 = vpop.permute.xlu0 %337 }
  0xb6   : > { %676 = vmatmul.mubr.msk.f32.gmra.mxu0 %vm380_vm7, %v290_v1  ;;  %682 = vmatmul.mubr.msk.f32.gmra.mxu1 %vm380_vm7, %v296_v2 }
  0xb7   : > { %506 = vmatprep.mubr.f32.mxu0 %v783_v9  ;;  %542 = vmatprep.mubr.f32.mxu1 %v783_v9  ;;  %v924_v14 = vpop.permute.xlu1 %342  ;;  %v926_v15 = vpop.permute.xlu0 %347 }
  0xba   : > { %677 = vmatmul.mubr.msk.f32.gmra.mxu0 %vm380_vm7, %v291_v3  ;;  %683 = vmatmul.mubr.msk.f32.gmra.mxu1 %vm380_vm7, %v297_v4 }
  0xbb   : > { %512 = vmatprep.mubr.f32.mxu0 %v783_v9  ;;  %548 = vmatprep.mubr.f32.mxu1 %v783_v9  ;;  %v358_v22 = vpop.permute.xlu0 %357 }
  0xbe   : > { %678 = vmatmul.mubr.msk.f32.gmra.mxu0 %vm380_vm7, %v292_v5  ;;  %684 = vmatmul.mubr.msk.f32.gmra.mxu1 %vm380_vm7, %v298_v6 }
  0xbf   : > { %518 = vmatprep.mubr.f32.mxu0 %v783_v9  ;;  %554 = vmatprep.mubr.f32.mxu1 %v783_v9  ;;  %v353_v9 = vpop.permute.xlu1 %352  ;;  %v368_v40 = vpop.permute.xlu0 %367 }
  0xc2   : > { %679 = vmatmul.mubr.msk.f32.gmra.mxu0 %vm380_vm7, %v293_v7  ;;  %685 = vmatmul.mubr.msk.f32.gmra.mxu1 %vm380_vm7, %v299_v8 }
  0xc3   : > { %v363_v31 = vpop.permute.xlu1 %362  ;;  %v378_v60 = vpop.permute.xlu0 %377 }
  0xc7   : > { %v373_v49 = vpop.permute.xlu1 %372 }
 0x16e   : > { %v490_v16 = vpop.f32.mrf.mxu0  ;;  %v526_v17 = vpop.f32.mrf.mxu1 }
 0x16f   : > { %v491_v18 = vadd.f32 %v490_v16, %v323_v11  ;;  %v527_v19 = vadd.f32 %v526_v17, %v353_v9 }
 0x170   : > { %v492_v20 = vpop.f32.mrf.mxu0  ;;  %v528_v21 = vpop.f32.mrf.mxu1 }
 0x171   : > { %v493_v23 = vadd.f32 %v492_v20, %v323_v11  ;;  %v529_v24 = vadd.f32 %v528_v21, %v353_v9  ;;  %721 = vtanh.f32 %v491_v18 }
 0x172   : > { %v496_v25 = vpop.f32.mrf.mxu0  ;;  %v532_v26 = vpop.f32.mrf.mxu1  ;;  %723 = vtanh.f32 %v527_v19 }
 0x173   : > { %v497_v27 = vadd.f32 %v496_v25, %v328_v10  ;;  %v533_v28 = vadd.f32 %v532_v26, %v358_v22  ;;  %725 = vtanh.f32 %v493_v23 }
 0x174   : > { %v498_v29 = vpop.f32.mrf.mxu0  ;;  %v534_v30 = vpop.f32.mrf.mxu1  ;;  %727 = vtanh.f32 %v529_v24 }
 0x175   : > { %v499_v32 = vadd.f32 %v498_v29, %v328_v10  ;;  %v535_v33 = vadd.f32 %v534_v30, %v358_v22  ;;  %729 = vtanh.f32 %v497_v27 }
 0x176   : > { %v502_v34 = vpop.f32.mrf.mxu0  ;;  %v538_v35 = vpop.f32.mrf.mxu1  ;;  %731 = vtanh.f32 %v533_v28 }
 0x177   : > { %v503_v36 = vadd.f32 %v502_v34, %v333_v12  ;;  %v539_v37 = vadd.f32 %v538_v35, %v363_v31  ;;  %733 = vtanh.f32 %v499_v32 }
 0x178   : > { %v504_v38 = vpop.f32.mrf.mxu0  ;;  %v540_v39 = vpop.f32.mrf.mxu1  ;;  %735 = vtanh.f32 %v535_v33 }
 0x179   : > { %v505_v41 = vadd.f32 %v504_v38, %v333_v12  ;;  %v541_v42 = vadd.f32 %v540_v39, %v363_v31  ;;  %737 = vtanh.f32 %v503_v36 }
 0x17a   : > { %v508_v43 = vpop.f32.mrf.mxu0  ;;  %v544_v44 = vpop.f32.mrf.mxu1  ;;  %739 = vtanh.f32 %v539_v37 }
 0x17b   : > { %v509_v45 = vadd.f32 %v508_v43, %v338_v13  ;;  %v545_v46 = vadd.f32 %v544_v44, %v368_v40  ;;  %741 = vtanh.f32 %v505_v41 }
 0x17c   : > { %v510_v47 = vpop.f32.mrf.mxu0  ;;  %v546_v48 = vpop.f32.mrf.mxu1  ;;  %743 = vtanh.f32 %v541_v42 }
 0x17d   : > { %v511_v50 = vadd.f32 %v510_v47, %v338_v13  ;;  %745 = vtanh.f32 %v509_v45  ;;  %v547_v10 = vadd.f32 %v546_v48, %v368_v40 }
 0x17e   : > { %v514_v51 = vpop.f32.mrf.mxu0  ;;  %v550_v52 = vpop.f32.mrf.mxu1  ;;  %747 = vtanh.f32 %v545_v46 }
 0x17f   : > { %v722_v53 = vpop.eup %721  ;;  %v515_v54 = vadd.f32 %v514_v51, %v924_v14  ;;  %v551_v55 = vadd.f32 %v550_v52, %v373_v49  ;;  %749 = vtanh.f32 %v511_v50 }
 0x180   : > { %v724_v56 = vpop.eup %723  ;;  %v516_v57 = vpop.f32.mrf.mxu0 }
 0x181   : > { %v552_v58 = vpop.f32.mrf.mxu1  ;;  %v726_v59 = vpop.eup %725  ;;  %751 = vtanh.f32 %v515_v54  ;;  %v517_v61 = vadd.f32 %v516_v57, %v924_v14 }
 0x182   : > { %v553_v62 = vadd.f32 %v552_v58, %v373_v49  ;;  %v728_v63 = vpop.eup %727  ;;  %753 = vtanh.f32 %v551_v55  ;;  %v520_v0 = vpop.f32.mrf.mxu0 }
 0x183   : > { %v556_v1 = vpop.f32.mrf.mxu1  ;;  %v730_v2 = vpop.eup %729  ;;  %755 = vtanh.f32 %v517_v61  ;;  %v521_v3 = vadd.f32 %v520_v0, %v926_v15 }
 0x184   : > { %v557_v4 = vadd.f32 %v556_v1, %v378_v60  ;;  %v732_v5 = vpop.eup %731  ;;  %757 = vtanh.f32 %v553_v62  ;;  %v522_v6 = vpop.f32.mrf.mxu0 }
 0x185   : > { %v558_v7 = vpop.f32.mrf.mxu1  ;;  %v734_v8 = vpop.eup %733  ;;  %759 = vtanh.f32 %v521_v3  ;;  %v523_v11 = vadd.f32 %v522_v6, %v926_v15 }
 0x186   : > { %v559_v12 = vadd.f32 %v558_v7, %v378_v60  ;;  %v736_v13 = vpop.eup %735  ;;  %761 = vtanh.f32 %v557_v4 }
 0x187   : > { %v738_v14 = vpop.eup %737  ;;  %763 = vtanh.f32 %v523_v11 }
 0x188   : > { %v740_v9 = vpop.eup %739  ;;  %765 = vtanh.f32 %v559_v12  ;;  %v581_v22 = vadd.f32 %v738_v14, %v724_v56 }
 0x189   : > { %v742_v16 = vpop.eup %741  ;;  %767 = vtanh.f32 %v547_v10 }
 0x18a   : > { %v744_v17 = vpop.eup %743  ;;  %v582_v25 = vadd.f32 %v742_v16, %v728_v63 }
 0x18b   : > { %v746_v18 = vpop.eup %745 }
 0x18c   : > { %v748_v19 = vpop.eup %747  ;;  %v583_v31 = vadd.f32 %v746_v18, %v732_v5 }
 0x18d   : > { %v750_v20 = vpop.eup %749 }
 0x18e   : > { %v752_v21 = vpop.eup %751  ;;  %v584_v37 = vadd.f32 %v750_v20, %v736_v13 }
 0x18f   : > { %v754_v23 = vpop.eup %753  ;;  %v577_v15 = vadd.f32 %v752_v21, %v722_v53 }
 0x190   : > { %v756_v24 = vpop.eup %755  ;;  %v597_v26 = vadd.f32 %v754_v23, %v581_v22 }
 0x191   : > { %v758_v27 = vpop.eup %757  ;;  %v593_v28 = vadd.f32 %v740_v9, %v577_v15  ;;  %v578_v29 = vadd.f32 %v756_v24, %v726_v59 }
 0x192   : > { %v760_v30 = vpop.eup %759  ;;  %605 = vst [vmem:[%s170_s25 + $0x20] sm:$0xff] %v597_v26  ;;  %v598_v32 = vadd.f32 %v758_v27, %v582_v25 }
 0x193   : > { %v762_v33 = vpop.eup %761  ;;  %601 = vst [vmem:[%s170_s25] sm:$0xff] %v593_v28  ;;  %v594_v34 = vadd.f32 %v744_v17, %v578_v29  ;;  %v579_v35 = vadd.f32 %v760_v30, %v730_v2 }
 0x194   : > { %v764_v36 = vpop.eup %763  ;;  %606 = vst [vmem:[%s170_s25 + $0x28] sm:$0xff] %v598_v32  ;;  %v599_v38 = vadd.f32 %v762_v33, %v583_v31 }
 0x195   : > { %v766_v39 = vpop.eup %765  ;;  %602 = vst [vmem:[%s170_s25 + $0x8] sm:$0xff] %v594_v34  ;;  %v595_v40 = vadd.f32 %v748_v19, %v579_v35  ;;  %v580_v41 = vadd.f32 %v764_v36, %v734_v8 }
 0x196   : > { %v768_v42 = vpop.eup %767  ;;  %607 = vst [vmem:[%s170_s25 + $0x30] sm:$0xff] %v599_v38  ;;  %v600_v43 = vadd.f32 %v766_v39, %v584_v37 }
 0x197   : > { %603 = vst [vmem:[%s170_s25 + $0x10] sm:$0xff] %v595_v40  ;;  %v596_v44 = vadd.f32 %v768_v42, %v580_v41 }
 0x198   : > { %608 = vst [vmem:[%s170_s25 + $0x38] sm:$0xff] %v600_v43 }
 0x199   : > { %604 = vst [vmem:[%s170_s25 + $0x18] sm:$0xff] %v596_v44 }
 0x19a PF: > { %s13_s12 = sadd.s32 1, %s775_s12  }
 0x19b   : > { %p10_p4 = scmp.ge.s32.totalorder %s13_s12, 4  }
 0x19d   :  { %12 = sbr.rel (!%p10_p4) target bundleno = 1 (0x1), region = 62 }

</bundles_post_ra>
